<compile_context>
chip_gen: v7x
topology: tpu7x:2x2x1
jax: 0.10.0
libtpu: 0.0.40
codegen_flags: <defaults>
</compile_context>

<pallas_src>
import functools

import jax
import jax.numpy as jnp
from jax.experimental import pallas as pl
from jax.experimental.pallas import tpu as pltpu


def _hloss_kernel(x_ref, o_ref, acc_ref, *, total_rows):
    """One (tb, C) row tile. Grid = (parallel_shards, steps); 'steps' is the
    sequential reduction axis. acc_ref is a per-shard (tb, 1) f32 accumulator."""
    p = pl.program_id(0)
    i = pl.program_id(1)
    steps = pl.num_programs(1)
    tb = x_ref.shape[0]

    @pl.when(i == 0)
    def _init():
        acc_ref[...] = jnp.zeros_like(acc_ref)

    # Rows that fall outside [0, B): last partial block and clamped/empty shard
    # iterations (their input block index is clamped in the index_map).
    block_idx = p * steps + i
    row = block_idx * tb + jax.lax.broadcasted_iota(jnp.int32, (tb, 1), 0)
    valid = row < total_rows                                # (tb, 1) bool

    x = x_ref[...].astype(jnp.float32)                      # (tb, C)
    # Scrub invalid rows BEFORE exp: padded garbage can never turn into inf/NaN.
    x = jnp.where(valid, x, 0.0)
    m = jnp.max(x, axis=1, keepdims=True)                   # (tb, 1)
    t = x - m                                               # (tb, C)
    e = jnp.exp(t)                                          # (tb, C)
    s = jnp.sum(e, axis=1, keepdims=True)                   # (tb, 1)
    w = jnp.sum(e * t, axis=1, keepdims=True)               # (tb, 1)
    # per-row entropy: H = log(s) - sum(e*t)/s  (== -sum(softmax * log_softmax))
    # Exact divide: s is (tb,1), ~1/C of the tile work, so exactness is free.
    ent = jnp.log(s) - w / s                                # (tb, 1)

    acc_ref[...] += jnp.where(valid, ent, 0.0)              # no cross-lane reduce here

    @pl.when(i == steps - 1)
    def _finalize():
        # single scalar collapse per shard, broadcast into the (1, 8, 128) out block
        total = jnp.sum(acc_ref[...])
        o_ref[...] = jnp.full(o_ref.shape, total, dtype=o_ref.dtype)


def _tpu_config():
    """Generation-aware VMEM/tiling config. Branch on per-core VMEM capacity:
    <= 64 MiB => v7x-class (2 TensorCores/chip); else v5e/v6e-class (1 TC)."""
    vmem_bytes = 128 * 1024 * 1024
    try:
        info = pltpu.get_tpu_info()
        vmem_bytes = int(getattr(info, "vmem_capacity_bytes", vmem_bytes))
    except Exception:
        pass
    if vmem_bytes <= 64 * 1024 * 1024:
        # v7x-class: 64 MiB VMEM per TC, 2 TCs -> shard batch across both cores.
        return dict(footprint_budget=24 << 20, vmem_limit_bytes=40 << 20,
                    num_parallel=2)
    # v5e/v6e-class: 128 MiB VMEM, single TC -> no parallel axis, bigger tiles.
    return dict(footprint_budget=64 << 20, vmem_limit_bytes=100 << 20,
                num_parallel=1)


def hloss(x, *, tb=None, num_parallel=None, vmem_limit_bytes=None):
    """Pallas TPU HLoss.forward for 2-D logits x of shape (B, C).

    x may be f32 or bf16 (bf16 is DMA'd as-is and upcast inside the kernel)."""
    B, C = x.shape
    cfg = _tpu_config()
    if num_parallel is None:
        num_parallel = cfg["num_parallel"]
    if vmem_limit_bytes is None:
        vmem_limit_bytes = cfg["vmem_limit_bytes"]

    itemsize = jnp.dtype(x.dtype).itemsize
    # Sub-32-bit dtypes pack rows along sublanes: bf16 needs 16-row blocks, 1B -> 32.
    row_align = {1: 32, 2: 16}.get(itemsize, 8)

    # Real per-row VMEM footprint of one grid step: double-buffered input block
    # + ~4 full-tile f32 temporaries (x_f32, t, e, e*t) from the elementwise chain.
    per_row_bytes = C * (2 * itemsize + 4 * 4)

    if tb is None:
        tb = cfg["footprint_budget"] // per_row_bytes
    padded_b = pl.cdiv(B, row_align) * row_align
    tb = int(min(tb, padded_b))                       # no point exceeding (padded) B
    tb = max(row_align, (tb // row_align) * row_align)

    # Huge-C guard: even a minimum-height block may overflow the configured scoped
    # VMEM limit (mostly a v7x concern); widen the limit to cover the estimate.
    # TODO(synk): for C so large that even tb=row_align overflows physical VMEM,
    # add a C-tiled online-softmax reduction path (extra reduction grid axis).
    est_bytes = tb * per_row_bytes + (1 << 20)
    vmem_limit_bytes = int(max(vmem_limit_bytes, est_bytes))

    nblocks = pl.cdiv(B, tb)
    num_parallel = max(1, min(int(num_parallel), nblocks))
    steps = pl.cdiv(nblocks, num_parallel)

    def x_index_map(p, i):
        # Clamp so iterations past the last block re-read the final block
        # (their contribution is masked to zero inside the kernel).
        return (jnp.minimum(p * steps + i, nblocks - 1), 0)

    kernel = functools.partial(_hloss_kernel, total_rows=B)
    cost = pl.CostEstimate(
        flops=6 * B * C,
        transcendentals=B * C + B,
        bytes_accessed=B * C * itemsize + num_parallel * 8 * 128 * 4,
    )

    partials = pl.pallas_call(
        kernel,
        out_shape=jax.ShapeDtypeStruct((num_parallel, 8, 128), jnp.float32),
        grid_spec=pltpu.PrefetchScalarGridSpec(
            num_scalar_prefetch=0,
            grid=(num_parallel, steps),
            in_specs=[pl.BlockSpec((tb, C), x_index_map)],
            out_specs=pl.BlockSpec((1, 8, 128), lambda p, i: (p, 0, 0)),
            scratch_shapes=[pltpu.VMEM((tb, 1), jnp.float32)],
        ),
        compiler_params=pltpu.CompilerParams(
            dimension_semantics=("parallel", "arbitrary"),
            vmem_limit_bytes=vmem_limit_bytes,
        ),
        cost_estimate=cost,
    )(x)

    # Per-shard partial sums live (broadcast) in each output block; finish the mean.
    return jnp.sum(partials[:, 0, 0]) / jnp.float32(B)


def hloss_ref(x):
    xf = x.astype(jnp.float32)
    logp = jax.nn.log_softmax(xf, axis=1)
    p = jax.nn.softmax(xf, axis=1)
    return jnp.mean(-jnp.sum(p * logp, axis=1))


if __name__ == "__main__":
    key = jax.random.PRNGKey(0)
    B, C = 20, 32                      # B not divisible by tile -> exercises masking
    x = jax.random.normal(key, (B, C), dtype=jnp.float32)

    # small explicit tile + forced 2-shard grid: exercises multi-block reduction,
    # both parallel shards, and the clamped/masked empty block.
    out_tiled = jax.block_until_ready(hloss(x, tb=8, num_parallel=2))
    # generation-aware auto path (single big tile for this small demo shape)
    out_auto = jax.block_until_ready(hloss(x))
    ref = jax.block_until_ready(hloss_ref(x))
    assert jnp.allclose(out_tiled, ref, atol=1e-4, rtol=1e-4), (out_tiled, ref)
    assert jnp.allclose(out_auto, ref, atol=1e-4, rtol=1e-4), (out_auto, ref)

    # bf16 path: 16-row-aligned block, in-kernel upcast, padded rows masked.
    x_bf16 = x.astype(jnp.bfloat16)
    out_bf16 = jax.block_until_ready(hloss(x_bf16))
    ref_bf16 = jax.block_until_ready(hloss_ref(x_bf16))
    assert jnp.allclose(out_bf16, ref_bf16, atol=1e-4, rtol=1e-4), (out_bf16, ref_bf16)

    print("KERNEL_OK")
</pallas_src>

<mosaic_0001>
module attributes {stable_mosaic.version = 11 : i64} {
  func.func @_hloss_kernel(%arg0: i32, %arg1: i32, %arg2: memref<8x32xf32, #tpu.memory_space<vmem>>, %arg3: memref<1x8x128xf32, #tpu.memory_space<vmem>>, %arg4: memref<8x1xf32, #tpu.memory_space<vmem>>) attributes {dimension_semantics = [#tpu.dimension_semantics<parallel>, #tpu.dimension_semantics<arbitrary>], iteration_bounds = array<i64: 2, 2>, scalar_prefetch = 0 : i64, scratch_operands = 1 : i64, tpu.core_type = #tpu.core_type<tc>, window_params = [{transform_indices = @transform_0, window_bounds = array<i64: 8, 32>}, {transform_indices = @transform_1, window_bounds = array<i64: 1, 8, 128>}]} {
    %c0_i32 = arith.constant 0 : i32
    %0 = arith.cmpi eq, %arg1, %c0_i32 : i32
    %1 = arith.extui %0 : i1 to i32
    %c0_i32_0 = arith.constant 0 : i32
    %2 = arith.cmpi ne, %1, %c0_i32_0 : i32
    scf.if %2 {
      %cst_11 = arith.constant 0.000000e+00 : f32
      %37 = vector.broadcast %cst_11 : f32 to vector<8x1xf32>
      %c0_12 = arith.constant 0 : index
      %c0_13 = arith.constant 0 : index
      %38 = vector.load %arg4[%c0_12, %c0_13] : memref<8x1xf32, #tpu.memory_space<vmem>>, vector<8x1xf32>
      tpu.vector_store %arg4[%c0_12, %c0_13], %37 {strides = array<i32>} : memref<8x1xf32, #tpu.memory_space<vmem>>, vector<8x1xf32>,
    } else {
    }
    %c2_i32 = arith.constant 2 : i32
    %3 = arith.muli %arg0, %c2_i32 : i32
    %4 = arith.addi %3, %arg1 : i32
    %c8_i32 = arith.constant 8 : i32
    %5 = arith.muli %4, %c8_i32 : i32
    %6 = tpu.iota {dimensions = array<i32: 0>} : vector<8x1xi32>
    %7 = vector.broadcast %5 : i32 to vector<8x1xi32>
    %8 = arith.addi %7, %6 : vector<8x1xi32>
    %c20_i32 = arith.constant 20 : i32
    %9 = vector.broadcast %c20_i32 : i32 to vector<8x1xi32>
    %10 = arith.cmpi slt, %8, %9 : vector<8x1xi32>
    %c0 = arith.constant 0 : index
    %c0_1 = arith.constant 0 : index
    %11 = vector.load %arg2[%c0, %c0_1] : memref<8x32xf32, #tpu.memory_space<vmem>>, vector<8x32xf32>
    %cst = arith.constant 0.000000e+00 : f32
    %12 = vector.shape_cast %10 : vector<8x1xi1> to vector<8x1xi1>
    %13 = vector.broadcast %12 : vector<8x1xi1> to vector<8x32xi1>
    %14 = vector.broadcast %cst : f32 to vector<8x32xf32>
    %15 = arith.select %13, %11, %14 : vector<8x32xi1>, vector<8x32xf32>
    %cst_2 = arith.constant dense<0xFF800000> : vector<8xf32>
    %16 = vector.multi_reduction <maximumf>, %15, %cst_2 [1] : vector<8x32xf32> to vector<8xf32>
    %17 = vector.shape_cast %16 : vector<8xf32> to vector<8x1xf32>
    %18 = vector.broadcast %17 : vector<8x1xf32> to vector<8x32xf32>
    %19 = arith.subf %15, %18 : vector<8x32xf32>
    %20 = math.exp %19 : vector<8x32xf32>
    %cst_3 = arith.constant dense<0.000000e+00> : vector<8xf32>
    %21 = vector.multi_reduction <add>, %20, %cst_3 [1] : vector<8x32xf32> to vector<8xf32>
    %22 = vector.shape_cast %21 : vector<8xf32> to vector<8x1xf32>
    %23 = arith.mulf %20, %19 : vector<8x32xf32>
    %cst_4 = arith.constant dense<0.000000e+00> : vector<8xf32>
    %24 = vector.multi_reduction <add>, %23, %cst_4 [1] : vector<8x32xf32> to vector<8xf32>
    %25 = vector.shape_cast %24 : vector<8xf32> to vector<8x1xf32>
    %26 = math.log %22 : vector<8x1xf32>
    %27 = arith.divf %25, %22 : vector<8x1xf32>
    %28 = arith.subf %26, %27 : vector<8x1xf32>
    %c0_5 = arith.constant 0 : index
    %c0_6 = arith.constant 0 : index
    %29 = vector.load %arg4[%c0_5, %c0_6] : memref<8x1xf32, #tpu.memory_space<vmem>>, vector<8x1xf32>
    %cst_7 = arith.constant 0.000000e+00 : f32
    %30 = vector.broadcast %cst_7 : f32 to vector<8x1xf32>
    %31 = arith.select %10, %28, %30 : vector<8x1xi1>, vector<8x1xf32>
    %32 = arith.addf %29, %31 : vector<8x1xf32>
    %c0_8 = arith.constant 0 : index
    %c0_9 = arith.constant 0 : index
    %33 = vector.load %arg4[%c0_8, %c0_9] : memref<8x1xf32, #tpu.memory_space<vmem>>, vector<8x1xf32>
    tpu.vector_store %arg4[%c0_8, %c0_9], %32 {strides = array<i32>} : memref<8x1xf32, #tpu.memory_space<vmem>>, vector<8x1xf32>,
    %c1_i32 = arith.constant 1 : i32
    %34 = arith.cmpi eq, %arg1, %c1_i32 : i32
    %35 = arith.extui %34 : i1 to i32
    %c0_i32_10 = arith.constant 0 : i32
    %36 = arith.cmpi ne, %35, %c0_i32_10 : i32
    scf.if %36 {
      %c0_11 = arith.constant 0 : index
      %c0_12 = arith.constant 0 : index
      %37 = vector.load %arg4[%c0_11, %c0_12] : memref<8x1xf32, #tpu.memory_space<vmem>>, vector<8x1xf32>
      %38 = vector.shape_cast %37 : vector<8x1xf32> to vector<1x8x1xf32>
      %cst_13 = arith.constant dense<0.000000e+00> : vector<1xf32>
      %39 = vector.multi_reduction <add>, %38, %cst_13 [1, 2] : vector<1x8x1xf32> to vector<1xf32>
      %40 = vector.shape_cast %39 : vector<1xf32> to vector<1x1x1xf32>
      %41 = vector.extract %40[0, 0, 0] : f32 from vector<1x1x1xf32>
      %42 = vector.broadcast %41 : f32 to vector<1x8x128xf32>
      %c0_14 = arith.constant 0 : index
      %c0_15 = arith.constant 0 : index
      %c0_16 = arith.constant 0 : index
      %43 = vector.load %arg3[%c0_14, %c0_15, %c0_16] : memref<1x8x128xf32, #tpu.memory_space<vmem>>, vector<1x8x128xf32>
      tpu.vector_store %arg3[%c0_14, %c0_15, %c0_16], %42 {strides = array<i32>} : memref<1x8x128xf32, #tpu.memory_space<vmem>>, vector<1x8x128xf32>,
    } else {
    }
    return
  }
  func.func @transform_0(%arg0: i32, %arg1: i32) -> (i32, i32) {
    %c2_i32 = arith.constant 2 : i32
    %0 = arith.muli %arg0, %c2_i32 : i32
    %1 = arith.addi %0, %arg1 : i32
    %c2_i32_0 = arith.constant 2 : i32
    %2 = arith.minsi %1, %c2_i32_0 : i32
    %c0_i32 = arith.constant 0 : i32
    %c0_i32_1 = arith.constant 0 : i32
    return %2, %c0_i32 : i32, i32
  }
  func.func @transform_1(%arg0: i32, %arg1: i32) -> (i32, i32, i32) {
    %c0_i32 = arith.constant 0 : i32
    %c0_i32_0 = arith.constant 0 : i32
    %c0_i32_1 = arith.constant 0 : i32
    return %arg0, %c0_i32, %c0_i32_0 : i32, i32, i32
  }
}

</mosaic_0001>

<bundles_post_ra>
// kernel: tpu_custom_call.1
= control target key start
LH: loop header
LB: loop body
LE: loop exit
PB: predicated region body
PF: predicated region fallthrough
CT: control target
= control target key end

     0   :  { %6 = vsyncpa [#allocation4], 0  ;;  %s850_s0 = inlined_call_operand.hbm [shape: f32[20,32], index: 0, kind: input, shape index: {}]   ;;  %s851_s1 = inlined_call_operand.hbm [shape: f32[2,8,128], index: 1, kind: output, shape index: {}]  }
   0x1   :  { %8 = vsyncpa [#allocation4 + $0x1], 0 }
   0x2   :  { %9 = vsyncpa [#allocation5], 0 }
   0x3   :  { %11 = vsyncpa [#allocation5 + $0x1], 0  ;;  %s612_s6 = smov 0   ;;  %s614_s7 = smov 0  }
   0x4   :  { %s616_s8 = smov 0   ;;  %s618_s9 = smov 0  }
   0x5   :  { %s620_s10 = smov 0   ;;  %s622_s11 = smov 0  }
   0x6   :  { %s624_s12 = smov 0   ;;  %s626_s13 = smov 0  }
   0x7   :  { %s628_s14 = smov 0   ;;  %s630_s15 = smov 0  }
   0x8   :  { %s632_s16 = smov 0  }
   0x9 LB: > { %s314_s17 = sadd.s32 4294967295, %s597_s16   ;;  %s315_s18 = sadd.s32 4294967294, %s597_s16   ;;  %s597_s16 = sphi %s632_s16, %s17_s16   ;;  %s593_s15 = sphi %s630_s15, %s871_s15   ;;  %s589_s14 = sphi %s628_s14, %s870_s14   ;;  %s585_s13 = sphi %s626_s13, %s869_s13   ;;  %s581_s12 = sphi %s624_s12, %s868_s12   ;;  %s577_s11 = sphi %s622_s11, %s867_s11   ;;  %s573_s10 = sphi %s620_s10, %s866_s10   ;;  %s569_s9 = sphi %s618_s9, %s865_s9   ;;  %s565_s8 = sphi %s616_s8, %s864_s8   ;;  %s561_s7 = sphi %s614_s7, %s863_s7   ;;  %s557_s6 = sphi %s612_s6, %s862_s6  }
   0xa   : > { %s26_s19 = sadd.s32 1, %s589_s14  ;;  %s29_s20 = sadd.s32 1, %s593_s15 }
   0xb   : > { %p27_p0 = scmp.ge.s32.totalorder %s26_s19, 2  ;;  %s316_s21 = sshll.u32 %s593_s15, 1 }
   0xc   : > { %s34_s22 = sadd.s32 %s589_s14, %s316_s21  ;;  %s44_s23 = sadd.s32 1, %s577_s11 }
   0xd   : > { %s873_s19 = smov (%p27_p0, %s26_s19), 0  ;;  %s875_s20 = smov (!%p27_p0, %s29_s20), %s593_s15 }
   0xe   : > { %p35_p1 = scmp.lt.s32.totalorder %s34_s22, 2  ;;  %p51_p2 = scmp.ne.s32.totalorder %s577_s11, %s573_s10 }
   0xf   : > { %p31_p3 = scmp.ge.s32.totalorder %s875_s20, 2  ;;  %p52_p4 = scmp.eq.s32.totalorder %s597_s16, 0 }
  0x10   : > { %s877_s22 = smov (!%p35_p1, %s34_s22), 2  ;;  %p57_p6 = scmp.ne.s32.totalorder %s573_s10, %s569_s9 }
  0x11   : > { %s879_s20 = smov (%p31_p3, %s875_s20), 0  ;;  %p682_p5 = por %p52_p4, %p51_p2 }
  0x12   : > { %s317_s25 = sshll.u32 %s879_s20, 1  ;;  %p58_p7 = scmp.eq.s32.totalorder %s314_s17, 0 }
  0x13   : > { %s38_s26 = sadd.s32 %s317_s25, %s873_s19  ;;  %s67_s27 = ssub.s32 %s593_s15, %s879_s20 }
  0x14   : > { %p39_p8 = scmp.lt.s32.totalorder %s38_s26, 2  ;;  %p694_p9 = por %p58_p7, %p57_p6 }
  0x15   : > { %p68_p10 = scmp.eq.s32.totalorder %s67_s27, 0  ;;  %s70_s29 = sadd.s32 1, %s565_s8 }
  0x16   : > { %s881_s26 = smov (!%p39_p8, %s38_s26), 2  ;;  %p80_p11 = scmp.ne.s32.totalorder %s565_s8, %s561_s7 }
  0x17   : > { %s700_s30 = scalar_select %p68_p10, %s565_s8, %s70_s29  }
  0x18   : > { %s41_s2 = ssub.s32 %s877_s22, %s881_s26  ;;  %p81_p13 = scmp.eq.s32.totalorder %s314_s17, 3 }
  0x19   : > { %p42_p12 = scmp.eq.s32.totalorder %s41_s2, 0  ;;  %p86_p0 = scmp.ne.s32.totalorder %s561_s7, %s557_s6 }
  0x1a   : > { %p87_p1 = scmp.eq.s32.totalorder %s315_s18, 3  ;;  %p713_p2 = por %p81_p13, %p80_p11 }
  0x1b   : > { %s711_s3 = scalar_select %p42_p12, %s577_s11, %s44_s23  }
  0x1c   : > { %s855_s4 = scalar_select %p713_p2, 1, 0 }
  0x1d   : > { %p717_p3 = por %p87_p1, %p86_p0  ;;  %p348_p4 = scmp.lt.s32.totalorder %s597_s16, 4 }
  0x1e   : > { %s107_s9 = sand.u32 1, %s577_s11   ;;  %s322_s21 = sshll.u32 %s877_s22, 7 }
  0x1f   : > { %s856_s5 = scalar_select %p717_p3, 1, 0 }
  0x20   : > { %s320_s25 = sshll.u32 %s107_s9, 3  ;;  %s726_s27 = scalar_lea.hbm %s850_s0, %s322_s21 }
  0x21   : > { %s111_s18 = scalar_lea.vmem [#allocation3], %s320_s25  ;;  %p730_p6 = pnand %p348_p4, %p682_p5 }
  0x22   : > { %s122_s23 = sshll.u32 %s111_s18, 4  ;;  %s108_s22 = scalar_lea.sflag [#allocation4], %s107_s9  ;;  %s734_s23 = int_to_ptr.vmem [resolvable:$true] %s122_s23 }
  0x23   : > { %s445_s2 = scalar_lea.hbm %s726_s27, 128  ;;  %p447_p11 = pneg %p730_p6 }
  0x24   : > { %p446_p10 = scmp.ne.s32.totalorder %s726_s27, %s445_s2  ;;  %s450_s25 = scalar_lea.hbm %s850_s0, 384 }
  0x25   : > { %p451_p5 = scmp.lt.u32.totalorder %s726_s27, %s850_s0  ;;  %p452_p0 = scmp.lt.u32.totalorder %s450_s25, %s445_s2 }
  0x26   : > { %p448_p12 = pnand %p447_p11, %p446_p10  ;;  %p454_p4 = scmp.lt.u32.totalorder %s445_s2, %s726_s27 }
  0x27   : > { %p453_p1 = por %p452_p0, %p451_p5 }
  0x28   : > { %p449_p13 = pneg %p448_p12 }
  0x29   : > { %p455_p7 = por %p454_p4, %p453_p1 }
  0x2b   : > { %p456_p8 = pnand %p455_p7, %p449_p13 }
  0x2d   : > { %459 = shalt.err (!%p456_p8)
}
  0x2e   : > { %s460_s9 = scalar_lea.vmem %s734_s23, 128  ;;  %s599_s18 = smov [#allocation3]  }
  0x2f   : > { %p461_p10 = scmp.ne.s32.totalorder %s734_s23, %s460_s9  ;;  %s465_s24 = sshll.u32 %s599_s18, 4  ;;  %s466_s24 = int_to_ptr.vmem [resolvable:$false] %s465_s24 }
  0x30   : > { %s467_s21 = scalar_lea.vmem %s466_s24, 256  ;;  %p468_p2 = scmp.lt.s32.totalorder %s734_s23, %s466_s24 }
  0x31   : > { %p463_p12 = pnand %p461_p10, %p447_p11  ;;  %p469_p5 = scmp.lt.s32.totalorder %s467_s21, %s460_s9 }
  0x33   : > { %p464_p3 = pneg %p463_p12  ;;  %p470_p0 = por %p469_p5, %p468_p2 }
  0x35   : > { %p471_p1 = pnand %p470_p0, %p464_p3 }
  0x37   : > { %474 = shalt.err (!%p471_p1)
}
  0x38   : > { %343 = dma.hbm_to_vmem [thread:$0]  (!%p730_p6), %s726_s27, 128, %s734_s23, %s108_s22  }
  0x39   : > { %p858_p7 = scmp.lt.s32.totalorder %s597_s16, 5  ;;  %p859_p8 = scmp.ge.s32.totalorder %s597_s16, 1 }
  0x3b   : > { %p128_p11 = pnand %p859_p8, %p858_p7 }
  0x3c   : > { %s133_s2 = sand.u32 (!%p128_p11), 1, %s573_s10  }
  0x3d   : > { %131 = sbr.rel (%p128_p11) target bundleno = 646 (0x286), region = 24  ;;  %s324_s25 = sshll.u32 (!%p128_p11), %s133_s2, 3 }
  0x3e   : > { %s134_s26 = scalar_lea.sflag (!%p128_p11), [#allocation4], %s133_s2  ;;  %s137_s17 = scalar_lea.vmem (!%p128_p11), [#allocation3], %s324_s25 }
  0x44   : > { %548 = dma.done.wait (%p694_p9), %s134_s26, 128  }
  0x45   : > { %550 = vsyncadd (%p694_p9), %s134_s26, 4294967168  ;;  %s153_s29 = sand.u32 1, %s561_s7   ;;  %p326_p2 = scmp.ne.s32.totalorder %s581_s12, 0 }
  0x46   : > { %s775_s27 = sshll.u32 %s153_s29, 3  ;;  %vm164_vm0 = vcmask (!%p326_p2), 7168   ;;  %v600_v0 = vmov (!%p326_p2), 0.0  }
  0x47   : > { %s155_s23 = scalar_lea.vmem [#allocation6], %s775_s27  ;;  %163 = sbr.rel (%p326_p2) target bundleno = 78 (0x4e), region = 32  ;;  %165 = vst.msk [vmem:[#allocation2] sm:$0xff] (!%p326_p2), %vm164_vm0, %v600_v0 }
  0x4e PF: > { %s327_s22 = sshll.u32 %s585_s13, 1  ;;  %v169_v1 = vlaneseq  ;;  %v174_v5 = vld [vmem:[%s137_s17] sm:$0xff]  ;;  %vm178_vm1 = vcmask 261120   ;;  %v197_v21 = vld [vmem:[#allocation2] sm:$0xff]  ;;  %vm200_vm3 = vcmask 7168   ;;  %p329_p9 = scmp.ne.s32.totalorder %s581_s12, 1 }
  0x4f   : > { %s167_s28 = sadd.s32 %s581_s12, %s327_s22 }
  0x50   : > { %s328_s9 = sshll.u32 %s167_s28, 3  ;;  %v170_v2 = vshrl.u32 %v169_v1, 7 }
  0x51   : > { %v171_v3 = vstv %s328_s9 }
  0x52   : > { %v172_v4 = vadd.s32 %v171_v3, %v170_v2 }
  0x54   : > { %vm173_vm2 = vcmp.lt.s32.totalorder %v172_v4, 20 }
  0x55   : > { %v177_v6 = vsel %vm173_vm2, %v174_v5, 0.0 }
  0x56   : > { %v179_v7 = vsel %vm178_vm1, %v177_v6, -inf }
  0x57   : > { %180 = vmax.xlane.f32.xlu0 %v179_v7 }
  0xe4   : > { %v181_v8 = vpop.xlane.xlu0 %180 }
  0xe5   : > { %v182_v9 = vsub.f32 %v177_v6, %v181_v8 }
  0xe7   : > { %v183_v10 = vmul.f32 1.442695, %v182_v9 }
  0xe9   : > { %439 = vpow2.f32 %v183_v10 }
  0xf3   : > { %v440_v11 = vpop.eup %439 }
  0xf4   : > { %v185_v12 = vsel %vm178_vm1, %v440_v11, 0.0  ;;  %v188_v13 = vmul.f32 %v440_v11, %v182_v9 }
  0xf5   : > { %186 = vadd.xlane.f32.xlu0 %v185_v12 }
  0xf6   : > { %v189_v14 = vsel %vm178_vm1, %v188_v13, 0.0 }
  0xf7   : > { %190 = vadd.xlane.f32.xlu1 %v189_v14 }
 0x182   : > { %v187_v15 = vpop.xlane.xlu0 %186 }
 0x183   : > { %441 = vlog2.f32 %v187_v15 }
 0x184   : > { %443 = vrcp.f32 %v187_v15  ;;  %v191_v19 = vpop.xlane.xlu1 %190 }
 0x18d   : > { %v442_v16 = vpop.eup %441 }
 0x18e   : > { %v444_v17 = vpop.eup %443  ;;  %v193_v18 = vmul.f32 0.6931472, %v442_v16 }
 0x18f   : > { %v195_v20 = vmul.f32 %v444_v17, %v191_v19 }
 0x190   : > { %205 = sbr.rel (%p329_p9) target bundleno = 621 (0x26d), region = 36 }
 0x191   : > { %v196_v22 = vsub.f32 %v193_v18, %v195_v20 }
 0x193   : > { %v198_v23 = vsel %vm173_vm2, %v196_v22, 0.0 }
 0x194   : > { %v199_v24 = vadd.f32 %v198_v23, %v197_v21 }
 0x196   : > { %201 = vst.msk [vmem:[#allocation2] sm:$0xff] %vm200_vm3, %v199_v24 }
 0x19d   : > { %v206_v25 = vld [vmem:[#allocation2] sm:$0xff] }
 0x19e   : > { %v207_v26 = vsel %vm200_vm3, %v206_v25, 0.0 }
 0x19f   : > { %208 = vadd.xlane.f32.xlu0 %v207_v26 }
 0x22c   : > { %v209_v27 = vpop.xlane.xlu0 %208 }
 0x22d   : > { %v210_v28 = vrot.slane %v209_v27, 4 }
 0x22f   : > { %v211_v29 = vadd.f32 %v210_v28, %v209_v27 }
 0x231   : > { %v212_v30 = vrot.slane %v211_v29, 2 }
 0x233   : > { %v213_v31 = vadd.f32 %v212_v30, %v211_v29 }
 0x235   : > { %v214_v32 = vrot.slane %v213_v31, 1 }
 0x237   : > { %v215_v33 = vadd.f32 %v214_v32, %v213_v31 }
 0x239   : > { %334 = vpush %v215_v33 }
 0x26a   : > { %s335_s18 = spop %334 }
 0x26b   : > { %v217_v34 = vstv %s335_s18 }
 0x26c   : > { %218 = vst [vmem:[%s155_s23] sm:$0xff] %v217_v34 }
 0x26d PF: > { %s331_s12 = sshll.u32 %s585_s13, 7  ;;  %s233_s25 = sshll.u32 %s155_s23, 4  ;;  %s234_s25 = int_to_ptr.vmem [resolvable:$true] %s233_s25 }
 0x26e   : > { %s790_s2 = scalar_lea.hbm %s851_s1, %s331_s12  ;;  %s220_s26 = scalar_lea.sflag [#allocation5], %s153_s29 }
 0x26f   : > { %s475_s17 = scalar_lea.vmem %s234_s25, 128  ;;  %p860_p6 = scmp.ne.s32.totalorder %s855_s4, 0 }
 0x270   : > { %p476_p3 = scmp.ne.s32.totalorder %s234_s25, %s475_s17  ;;  %s601_s22 = smov [#allocation6]  }
 0x271   : > { %s479_s28 = sshll.u32 %s601_s22, 4  ;;  %s480_s28 = int_to_ptr.vmem [resolvable:$false] %s479_s28 }
 0x272   : > { %p477_p13 = pnand %p476_p3, %p860_p6  ;;  %s481_s9 = scalar_lea.vmem %s480_s28, 256 }
 0x273   : > { %p482_p10 = scmp.lt.s32.totalorder %s234_s25, %s480_s28  ;;  %p483_p12 = scmp.lt.s32.totalorder %s481_s9, %s475_s17 }
 0x274   : > { %p478_p4 = pneg %p477_p13 }
 0x275   : > { %p484_p5 = por %p483_p12, %p482_p10 }
 0x277   : > { %p485_p0 = pnand %p484_p5, %p478_p4 }
 0x279   : > { %488 = shalt.err (!%p485_p0)
}
 0x27a   : > { %s489_s13 = scalar_lea.hbm %s790_s2, 128  ;;  %s493_s23 = scalar_lea.hbm %s851_s1, 256 }
 0x27b   : > { %p490_p1 = scmp.ne.s32.totalorder %s790_s2, %s489_s13  ;;  %p494_p11 = scmp.lt.u32.totalorder %s790_s2, %s851_s1 }
 0x27c   : > { %p495_p2 = scmp.lt.u32.totalorder %s493_s23, %s489_s13  ;;  %p497_p3 = scmp.lt.u32.totalorder %s489_s13, %s790_s2 }
 0x27d   : > { %p491_p7 = pnand %p490_p1, %p860_p6 }
 0x27e   : > { %p496_p9 = por %p495_p2, %p494_p11 }
 0x27f   : > { %p492_p8 = pneg %p491_p7 }
 0x280   : > { %p498_p13 = por %p497_p3, %p496_p9 }
 0x282   : > { %p499_p4 = pnand %p498_p13, %p492_p8 }
 0x284   : > { %502 = shalt.err (!%p499_p4)
}
 0x285   : > { %338 = dma.vmem_to_hbm [thread:$0]  (%p860_p6), %s234_s25, 128, %s790_s2, %s220_s26  }
 0x286 PF: > { %p349_p10 = scmp.ge.s32.totalorder %s597_s16, 2  ;;  %s245_s24 = sand.u32 1, %s557_s6  }
 0x287   : > { %p861_p12 = scmp.ne.s32.totalorder %s856_s5, 0  ;;  %s246_s21 = scalar_lea.sflag [#allocation5], %s245_s24 }
 0x289   : > { %p345_p5 = pnand %p349_p10, %p861_p12 }
 0x28b   : > { %552 = dma.done.wait (!%p345_p5), %s246_s21, 128  }
 0x28c   : > { %554 = vsyncadd (!%p345_p5), %s246_s21, 4294967168  ;;  %s17_s16 = sadd.s32 1, %s597_s16   ;;  %s862_s6 = smov %s561_s7 }
 0x28d   : > { %p14_p0 = scmp.ge.s32.totalorder %s17_s16, 6   ;;  %s863_s7 = smov %s565_s8 }
 0x28e   : > { %s864_s8 = smov %s700_s30  ;;  %s865_s9 = smov %s573_s10 }
 0x28f   : > { %s866_s10 = smov %s577_s11  ;;  %s867_s11 = smov %s711_s3 }
 0x290   : > { %s868_s12 = smov %s589_s14  ;;  %s869_s13 = smov %s593_s15 }
 0x291   : > { %s870_s14 = smov %s873_s19  ;;  %s871_s15 = smov %s879_s20 }
 0x292   :  { %16 = sbr.rel (!%p14_p0) target bundleno = 9 (0x9), region = 77 }
 0x299   :  { %251 = vsyncpa [#allocation4], 1 }
 0x29a   :  { %253 = vsyncpa [#allocation4 + $0x1], 1 }
 0x29b   :  { %254 = vsyncpa [#allocation5], 1 }
 0x29c   :  { %256 = vsyncpa [#allocation5 + $0x1], 1 }

</bundles_post_ra>
